<compile_context>
chip_gen: v7x
topology: tpu7x:2x2x1
jax: 0.10.0
libtpu: 0.0.40
codegen_flags: <defaults>
</compile_context>

<pallas_src>
import math

import jax
import jax.numpy as jnp
from jax.experimental import pallas as pl
from jax.experimental.pallas import tpu as pltpu

# WingLoss hyper-parameters (from WingLoss.__init__ defaults)
WING_W = 10.0
WING_E = 2.0
INV_WING_E = 1.0 / WING_E
WING_C = WING_W - WING_W * math.log(1.0 + WING_W / WING_E)
ALPHA = 1.0  # LandmarksLoss alpha (unused in forward, kept for fidelity)

_LANES = 128
_SUBLANES = 8


def _make_kernel(tm_rows, n_steps, rows_valid):
    """Kernel over a (tm_rows, 128) tile; accumulates into (1,8,128) outputs."""

    def kernel(pred_ref, true_ref, mask_ref, wing_ref, msum_ref):
        c = pl.program_id(0)          # core / parallel axis
        j = pl.program_id(1)          # streaming reduction axis

        @pl.when(j == 0)
        def _():
            wing_ref[...] = jnp.zeros_like(wing_ref)
            msum_ref[...] = jnp.zeros_like(msum_ref)

        # Logical global row index of each sublane row in this tile.  Rows at
        # or beyond rows_valid are either OOB garbage (partial last block) or
        # duplicated reads (clamped index_map) and must contribute zero.
        row0 = (c * n_steps + j) * tm_rows
        rid = row0 + jax.lax.broadcasted_iota(jnp.int32, (tm_rows, 1), 0)
        valid = rid < rows_valid                              # (tm_rows, 1)

        x = pred_ref[...].astype(jnp.float32)
        t = true_ref[...].astype(jnp.float32)
        m = mask_ref[...].astype(jnp.float32)

        # LandmarksLoss.forward: pred*mask, truel*mask
        xm = x * m
        tmk = t * m

        # WingLoss.forward. Fold the row-validity mask into the sentinel test:
        # diff -> 0 -> y = w*log1p(0) = 0 for masked rows.
        drop = jnp.logical_or(tmk == -1.0, jnp.logical_not(valid))
        diff = jnp.where(drop, 0.0, xm - tmk)
        abs_diff = jnp.abs(diff)
        y = jnp.where(abs_diff < WING_W,
                      WING_W * jnp.log1p(abs_diff * INV_WING_E),   # log on EUP
                      abs_diff - WING_C)
        mv = jnp.where(valid, m, 0.0)

        # Vreg-wide partial sums: pure leading-axis VPU adds, no XLU per step.
        wing_ref[...] += jnp.sum(
            y.reshape(tm_rows // _SUBLANES, _SUBLANES, _LANES), axis=0)[None]
        msum_ref[...] += jnp.sum(
            mv.reshape(tm_rows // _SUBLANES, _SUBLANES, _LANES), axis=0)[None]

    return kernel


def landmarks_loss(pred, truel, mask, *, tile_m=2048, num_cores=2):
    """Pallas implementation of LandmarksLoss.forward. Returns a scalar."""
    assert pred.shape == truel.shape == mask.shape
    total = int(pred.size)
    rows = pl.cdiv(total, _LANES)

    # Lane-dense layout.  Zero-copy reshape when the flat size already fills
    # whole 128-lane rows and there are at least 8 rows; otherwise a single
    # small jnp.pad (zero padding is neutral: x=t=m=0 -> y=0, mask adds 0).
    needs_pad = (total % _LANES != 0) or (rows < _SUBLANES)
    if needs_pad:
        rows_use = max(_SUBLANES, ((rows + _SUBLANES - 1) // _SUBLANES) * _SUBLANES)
    else:
        rows_use = rows
    pad_elems = rows_use * _LANES - total

    def _as_rows(a):
        flat = a.reshape(-1)                      # free bitcast reshape
        if pad_elems:
            flat = jnp.pad(flat, (0, pad_elems))  # only on ragged inputs
        return flat.reshape(rows_use, _LANES)     # free

    p2, t2, m2 = _as_rows(pred), _as_rows(truel), _as_rows(mask)

    # Row tile: multiple of 8 sublanes, never larger than the array rows.
    tm = max(_SUBLANES, min(((int(tile_m) + 7) // 8) * 8,
                            (rows_use // _SUBLANES) * _SUBLANES))

    num_blocks = pl.cdiv(rows_use, tm)
    n_cores = max(1, min(int(num_cores), num_blocks))
    n_steps = pl.cdiv(num_blocks, n_cores)
    last_block = num_blocks - 1

    def in_map(c, j):
        # Clamp so the DMA start always stays in-bounds; duplicated / partial
        # tail blocks are zeroed in-kernel via the logical row-validity mask.
        return (jnp.minimum(c * n_steps + j, last_block), 0)

    in_spec = pl.BlockSpec((tm, _LANES), in_map)
    out_spec = pl.BlockSpec((1, _SUBLANES, _LANES), lambda c, j: (c, 0, 0))

    itemsize = sum(jnp.dtype(a.dtype).itemsize for a in (pred, truel, mask))
    vmem_need = 2 * tm * _LANES * itemsize + 4 * _SUBLANES * _LANES * 4
    vmem_limit = int(min(max(2 * vmem_need, 32 << 20), 64 << 20))

    wing_parts, mask_parts = pl.pallas_call(
        _make_kernel(tm, n_steps, rows_use),
        out_shape=(
            jax.ShapeDtypeStruct((n_cores, _SUBLANES, _LANES), jnp.float32),
            jax.ShapeDtypeStruct((n_cores, _SUBLANES, _LANES), jnp.float32),
        ),
        grid_spec=pltpu.PrefetchScalarGridSpec(
            num_scalar_prefetch=0,
            grid=(n_cores, n_steps),
            in_specs=[in_spec, in_spec, in_spec],
            out_specs=[out_spec, out_spec],
        ),
        compiler_params=pltpu.CompilerParams(
            dimension_semantics=("parallel", "arbitrary"),
            vmem_limit_bytes=vmem_limit),
        cost_estimate=pl.CostEstimate(
            flops=12 * total,
            transcendentals=total,
            bytes_accessed=total * itemsize + 2 * n_cores * _SUBLANES * _LANES * 4),
    )(p2, t2, m2)

    # Tiny final reductions + divide (exactly the module's loss / (sum+eps)).
    return jnp.sum(wing_parts) / (jnp.sum(mask_parts) + 1e-13)


def landmarks_loss_ref(pred, truel, mask):
    """Pure-JAX reference matching the PyTorch module semantics."""
    x = pred * mask
    t = truel * mask
    weight = jnp.where(t == -1.0, 0.0, 1.0)
    diff = weight * (x - t)
    abs_diff = jnp.abs(diff)
    flag = (abs_diff < WING_W).astype(jnp.float32)
    y = flag * WING_W * jnp.log(1.0 + abs_diff / WING_E) \
        + (1.0 - flag) * (abs_diff - WING_C)
    return jnp.sum(y) / (jnp.sum(mask) + 1e-13)


if __name__ == "__main__":
    key = jax.random.PRNGKey(0)
    k1, k2, k3 = jax.random.split(key, 3)

    # Case 1: N matched targets, 5 landmarks * 2 coords each (tiny, ragged).
    N, L = 16, 10
    pred = jax.random.normal(k1, (N, L), dtype=jnp.float32) * 4.0
    truel = jax.random.normal(k2, (N, L), dtype=jnp.float32) * 4.0
    missing = jax.random.bernoulli(k3, 0.2, (N, L))
    truel = jnp.where(missing, -1.0, truel)
    mask = jnp.where(missing, 0.0, 1.0).astype(jnp.float32)

    loss = landmarks_loss(pred, truel, mask)
    jax.block_until_ready(loss)
    ref = landmarks_loss_ref(pred, truel, mask)
    assert jnp.allclose(loss, ref, rtol=1e-5, atol=1e-5), (loss, ref)

    # Case 2: exercise multi-tile streaming, the 2-way parallel split and the
    # clamped / masked tail-block paths with a deliberately small tile.
    N2 = 500
    pred2 = jax.random.normal(k1, (N2, L), dtype=jnp.float32) * 4.0
    truel2 = jax.random.normal(k2, (N2, L), dtype=jnp.float32) * 4.0
    missing2 = jax.random.bernoulli(k3, 0.3, (N2, L))
    truel2 = jnp.where(missing2, -1.0, truel2)
    mask2 = jnp.where(missing2, 0.0, 1.0).astype(jnp.float32)

    loss2 = landmarks_loss(pred2, truel2, mask2, tile_m=8, num_cores=2)
    jax.block_until_ready(loss2)
    ref2 = landmarks_loss_ref(pred2, truel2, mask2)
    assert jnp.allclose(loss2, ref2, rtol=1e-5, atol=1e-5), (loss2, ref2)

    print("KERNEL_OK")
</pallas_src>

<mosaic_0001>
module attributes {stable_mosaic.version = 11 : i64} {
  func.func @kernel(%arg0: i32, %arg1: i32, %arg2: memref<8x128xf32, #tpu.memory_space<vmem>>, %arg3: memref<8x128xf32, #tpu.memory_space<vmem>>, %arg4: memref<8x128xf32, #tpu.memory_space<vmem>>, %arg5: memref<1x8x128xf32, #tpu.memory_space<vmem>>, %arg6: memref<1x8x128xf32, #tpu.memory_space<vmem>>) attributes {dimension_semantics = [#tpu.dimension_semantics<parallel>, #tpu.dimension_semantics<arbitrary>], iteration_bounds = array<i64: 1, 1>, scalar_prefetch = 0 : i64, scratch_operands = 0 : i64, tpu.core_type = #tpu.core_type<tc>, window_params = [{transform_indices = @transform_0, window_bounds = array<i64: 8, 128>}, {transform_indices = @transform_1, window_bounds = array<i64: 8, 128>}, {transform_indices = @transform_2, window_bounds = array<i64: 8, 128>}, {transform_indices = @transform_3, window_bounds = array<i64: 1, 8, 128>}, {transform_indices = @transform_4, window_bounds = array<i64: 1, 8, 128>}]} {
    %c0_i32 = arith.constant 0 : i32
    %0 = arith.cmpi eq, %arg1, %c0_i32 : i32
    %1 = arith.extui %0 : i1 to i32
    %c0_i32_0 = arith.constant 0 : i32
    %2 = arith.cmpi ne, %1, %c0_i32_0 : i32
    scf.if %2 {
      %cst_28 = arith.constant 0.000000e+00 : f32
      %51 = vector.broadcast %cst_28 : f32 to vector<1x8x128xf32>
      %c0_29 = arith.constant 0 : index
      %c0_30 = arith.constant 0 : index
      %c0_31 = arith.constant 0 : index
      %52 = vector.load %arg5[%c0_29, %c0_30, %c0_31] : memref<1x8x128xf32, #tpu.memory_space<vmem>>, vector<1x8x128xf32>
      tpu.vector_store %arg5[%c0_29, %c0_30, %c0_31], %51 {strides = array<i32>} : memref<1x8x128xf32, #tpu.memory_space<vmem>>, vector<1x8x128xf32>,
      %cst_32 = arith.constant 0.000000e+00 : f32
      %53 = vector.broadcast %cst_32 : f32 to vector<1x8x128xf32>
      %c0_33 = arith.constant 0 : index
      %c0_34 = arith.constant 0 : index
      %c0_35 = arith.constant 0 : index
      %54 = vector.load %arg6[%c0_33, %c0_34, %c0_35] : memref<1x8x128xf32, #tpu.memory_space<vmem>>, vector<1x8x128xf32>
      tpu.vector_store %arg6[%c0_33, %c0_34, %c0_35], %53 {strides = array<i32>} : memref<1x8x128xf32, #tpu.memory_space<vmem>>, vector<1x8x128xf32>,
    } else {
    }
    %c1_i32 = arith.constant 1 : i32
    %3 = arith.muli %arg0, %c1_i32 : i32
    %4 = arith.addi %3, %arg1 : i32
    %c8_i32 = arith.constant 8 : i32
    %5 = arith.muli %4, %c8_i32 : i32
    %6 = tpu.iota {dimensions = array<i32: 0>} : vector<8x1xi32>
    %7 = vector.broadcast %5 : i32 to vector<8x1xi32>
    %8 = arith.addi %7, %6 : vector<8x1xi32>
    %c8_i32_1 = arith.constant 8 : i32
    %9 = vector.broadcast %c8_i32_1 : i32 to vector<8x1xi32>
    %10 = arith.cmpi slt, %8, %9 : vector<8x1xi32>
    %c0 = arith.constant 0 : index
    %c0_2 = arith.constant 0 : index
    %11 = vector.load %arg2[%c0, %c0_2] : memref<8x128xf32, #tpu.memory_space<vmem>>, vector<8x128xf32>
    %c0_3 = arith.constant 0 : index
    %c0_4 = arith.constant 0 : index
    %12 = vector.load %arg3[%c0_3, %c0_4] : memref<8x128xf32, #tpu.memory_space<vmem>>, vector<8x128xf32>
    %c0_5 = arith.constant 0 : index
    %c0_6 = arith.constant 0 : index
    %13 = vector.load %arg4[%c0_5, %c0_6] : memref<8x128xf32, #tpu.memory_space<vmem>>, vector<8x128xf32>
    %14 = arith.mulf %11, %13 : vector<8x128xf32>
    %15 = arith.mulf %12, %13 : vector<8x128xf32>
    %cst = arith.constant -1.000000e+00 : f32
    %16 = vector.broadcast %cst : f32 to vector<8x128xf32>
    %17 = arith.cmpf oeq, %15, %16 : vector<8x128xf32>
    %cst_7 = arith.constant dense<true> : vector<8x1xi1>
    %18 = arith.xori %10, %cst_7 : vector<8x1xi1>
    %19 = vector.broadcast %18 : vector<8x1xi1> to vector<8x128xi1>
    %20 = arith.ori %17, %19 : vector<8x128xi1>
    %21 = arith.subf %14, %15 : vector<8x128xf32>
    %cst_8 = arith.constant 0.000000e+00 : f32
    %22 = vector.broadcast %cst_8 : f32 to vector<8x128xf32>
    %23 = arith.select %20, %22, %21 : vector<8x128xi1>, vector<8x128xf32>
    %24 = math.absf %23 : vector<8x128xf32>
    %cst_9 = arith.constant 1.000000e+01 : f32
    %25 = vector.broadcast %cst_9 : f32 to vector<8x128xf32>
    %26 = arith.cmpf olt, %24, %25 : vector<8x128xf32>
    %cst_10 = arith.constant 5.000000e-01 : f32
    %27 = vector.broadcast %cst_10 : f32 to vector<8x128xf32>
    %28 = arith.mulf %24, %27 : vector<8x128xf32>
    %29 = math.log1p %28 : vector<8x128xf32>
    %cst_11 = arith.constant 1.000000e+01 : f32
    %30 = vector.broadcast %cst_11 : f32 to vector<8x128xf32>
    %31 = arith.mulf %30, %29 : vector<8x128xf32>
    %cst_12 = arith.constant -7.9175949 : f32
    %32 = vector.broadcast %cst_12 : f32 to vector<8x128xf32>
    %33 = arith.subf %24, %32 : vector<8x128xf32>
    %34 = arith.select %26, %31, %33 : vector<8x128xi1>, vector<8x128xf32>
    %cst_13 = arith.constant 0.000000e+00 : f32
    %35 = vector.shape_cast %10 : vector<8x1xi1> to vector<8x1xi1>
    %36 = vector.broadcast %35 : vector<8x1xi1> to vector<8x128xi1>
    %37 = vector.broadcast %cst_13 : f32 to vector<8x128xf32>
    %38 = arith.select %36, %13, %37 : vector<8x128xi1>, vector<8x128xf32>
    %c0_14 = arith.constant 0 : index
    %c0_15 = arith.constant 0 : index
    %c0_16 = arith.constant 0 : index
    %39 = vector.load %arg5[%c0_14, %c0_15, %c0_16] : memref<1x8x128xf32, #tpu.memory_space<vmem>>, vector<1x8x128xf32>
    %40 = vector.shape_cast %34 : vector<8x128xf32> to vector<1x8x128xf32>
    %cst_17 = arith.constant dense<0.000000e+00> : vector<8x128xf32>
    %41 = vector.multi_reduction <add>, %40, %cst_17 [0] : vector<1x8x128xf32> to vector<8x128xf32>
    %42 = vector.shape_cast %41 : vector<8x128xf32> to vector<1x8x128xf32>
    %43 = arith.addf %39, %42 : vector<1x8x128xf32>
    %c0_18 = arith.constant 0 : index
    %c0_19 = arith.constant 0 : index
    %c0_20 = arith.constant 0 : index
    %44 = vector.load %arg5[%c0_18, %c0_19, %c0_20] : memref<1x8x128xf32, #tpu.memory_space<vmem>>, vector<1x8x128xf32>
    tpu.vector_store %arg5[%c0_18, %c0_19, %c0_20], %43 {strides = array<i32>} : memref<1x8x128xf32, #tpu.memory_space<vmem>>, vector<1x8x128xf32>,
    %c0_21 = arith.constant 0 : index
    %c0_22 = arith.constant 0 : index
    %c0_23 = arith.constant 0 : index
    %45 = vector.load %arg6[%c0_21, %c0_22, %c0_23] : memref<1x8x128xf32, #tpu.memory_space<vmem>>, vector<1x8x128xf32>
    %46 = vector.shape_cast %38 : vector<8x128xf32> to vector<1x8x128xf32>
    %cst_24 = arith.constant dense<0.000000e+00> : vector<8x128xf32>
    %47 = vector.multi_reduction <add>, %46, %cst_24 [0] : vector<1x8x128xf32> to vector<8x128xf32>
    %48 = vector.shape_cast %47 : vector<8x128xf32> to vector<1x8x128xf32>
    %49 = arith.addf %45, %48 : vector<1x8x128xf32>
    %c0_25 = arith.constant 0 : index
    %c0_26 = arith.constant 0 : index
    %c0_27 = arith.constant 0 : index
    %50 = vector.load %arg6[%c0_25, %c0_26, %c0_27] : memref<1x8x128xf32, #tpu.memory_space<vmem>>, vector<1x8x128xf32>
    tpu.vector_store %arg6[%c0_25, %c0_26, %c0_27], %49 {strides = array<i32>} : memref<1x8x128xf32, #tpu.memory_space<vmem>>, vector<1x8x128xf32>,
    return
  }
  func.func @transform_0(%arg0: i32, %arg1: i32) -> (i32, i32) {
    %c1_i32 = arith.constant 1 : i32
    %0 = arith.muli %arg0, %c1_i32 : i32
    %1 = arith.addi %0, %arg1 : i32
    %c0_i32 = arith.constant 0 : i32
    %2 = arith.minsi %1, %c0_i32 : i32
    %c0_i32_0 = arith.constant 0 : i32
    %c0_i32_1 = arith.constant 0 : i32
    return %2, %c0_i32_0 : i32, i32
  }
  func.func @transform_1(%arg0: i32, %arg1: i32) -> (i32, i32) {
    %c1_i32 = arith.constant 1 : i32
    %0 = arith.muli %arg0, %c1_i32 : i32
    %1 = arith.addi %0, %arg1 : i32
    %c0_i32 = arith.constant 0 : i32
    %2 = arith.minsi %1, %c0_i32 : i32
    %c0_i32_0 = arith.constant 0 : i32
    %c0_i32_1 = arith.constant 0 : i32
    return %2, %c0_i32_0 : i32, i32
  }
  func.func @transform_2(%arg0: i32, %arg1: i32) -> (i32, i32) {
    %c1_i32 = arith.constant 1 : i32
    %0 = arith.muli %arg0, %c1_i32 : i32
    %1 = arith.addi %0, %arg1 : i32
    %c0_i32 = arith.constant 0 : i32
    %2 = arith.minsi %1, %c0_i32 : i32
    %c0_i32_0 = arith.constant 0 : i32
    %c0_i32_1 = arith.constant 0 : i32
    return %2, %c0_i32_0 : i32, i32
  }
  func.func @transform_3(%arg0: i32, %arg1: i32) -> (i32, i32, i32) {
    %c0_i32 = arith.constant 0 : i32
    %c0_i32_0 = arith.constant 0 : i32
    %c0_i32_1 = arith.constant 0 : i32
    return %arg0, %c0_i32, %c0_i32_0 : i32, i32, i32
  }
  func.func @transform_4(%arg0: i32, %arg1: i32) -> (i32, i32, i32) {
    %c0_i32 = arith.constant 0 : i32
    %c0_i32_0 = arith.constant 0 : i32
    %c0_i32_1 = arith.constant 0 : i32
    return %arg0, %c0_i32, %c0_i32_0 : i32, i32, i32
  }
}

</mosaic_0001>

<bundles_post_ra>
// kernel: tpu_custom_call.1
= control target key start
LH: loop header
LB: loop body
LE: loop exit
PB: predicated region body
PF: predicated region fallthrough
CT: control target
= control target key end

     0   :  { %10 = vsyncpa [#allocation3], 0  ;;  %s382_s0 = inlined_call_operand.hbm [shape: f32[8,128], index: 0, kind: input, shape index: {}]   ;;  %s383_s1 = inlined_call_operand.hbm [shape: f32[8,128], index: 1, kind: input, shape index: {}]   ;;  %s384_s2 = inlined_call_operand.hbm [shape: f32[8,128], index: 2, kind: input, shape index: {}]   ;;  %s385_s3 = inlined_call_operand.hbm [shape: f32[1,8,128], index: 3, kind: output, shape index: {0}]   ;;  %s386_s4 = inlined_call_operand.hbm [shape: f32[1,8,128], index: 4, kind: output, shape index: {1}]  }
   0x1   :  { %11 = vsyncpa [#allocation6], 0 }
   0x2   :  { %12 = vsyncpa [#allocation4], 0 }
   0x3   :  { %13 = vsyncpa [#allocation10], 0  ;;  %s291_s15 = smov [#allocation5]   ;;  %s292_s17 = smov [#allocation2]  }
   0x4   :  { %s40_s16 = sshll.u32 %s291_s15, 4  ;;  %s25_s18 = sshll.u32 %s292_s17, 4  ;;  %s41_s16 = int_to_ptr.vmem [resolvable:$true] %s40_s16  ;;  %s26_s18 = int_to_ptr.vmem [resolvable:$true] %s25_s18 }
   0x5   :  { %s173_s21 = scalar_lea.hbm %s383_s1, 128 }
   0x6   :  { %p174_p0 = scmp.ne.s32.totalorder %s383_s1, %s173_s21  ;;  %p177_p1 = scmp.lt.u32.totalorder %s173_s21, %s383_s1 }
   0x8   :  { %p179_p2 = pnand %p177_p1, %p174_p0 }
   0xa   :  { %182 = shalt.err (!%p179_p2)
}
   0xb   :  { %s183_s26 = scalar_lea.vmem %s41_s16, 128  ;;  %p188_p4 = scmp.lt.s32.totalorder %s41_s16, %s41_s16 }
   0xc   :  { %p184_p3 = scmp.ne.s32.totalorder %s41_s16, %s183_s26  ;;  %p189_p5 = scmp.lt.s32.totalorder %s183_s26, %s183_s26 }
   0xe   :  { %p190_p6 = por %p189_p5, %p188_p4 }
  0x10   :  { %p191_p7 = pnand %p190_p6, %p184_p3 }
  0x12   :  { %194 = shalt.err (!%p191_p7)
}
  0x13   :  { %43 = dma.hbm_to_vmem [thread:$0]  %s383_s1, 128, %s41_s16, [#allocation6]  }
  0x14   :  { %s195_s5 = scalar_lea.hbm %s382_s0, 128 }
  0x15   :  { %p196_p8 = scmp.ne.s32.totalorder %s382_s0, %s195_s5  ;;  %p199_p9 = scmp.lt.u32.totalorder %s195_s5, %s382_s0 }
  0x17   :  { %p201_p10 = pnand %p199_p9, %p196_p8 }
  0x19   :  { %204 = shalt.err (!%p201_p10)
}
  0x1a   :  { %s205_s10 = scalar_lea.vmem %s26_s18, 128  ;;  %p210_p12 = scmp.lt.s32.totalorder %s26_s18, %s26_s18 }
  0x1b   :  { %p206_p11 = scmp.ne.s32.totalorder %s26_s18, %s205_s10  ;;  %p211_p13 = scmp.lt.s32.totalorder %s205_s10, %s205_s10 }
  0x1d   :  { %p212_p0 = por %p211_p13, %p210_p12 }
  0x1f   :  { %p213_p1 = pnand %p212_p0, %p206_p11 }
  0x21   :  { %216 = shalt.err (!%p213_p1)
}
  0x22   :  { %28 = dma.hbm_to_vmem [thread:$0]  %s382_s0, 128, %s26_s18, [#allocation3]  }
  0x23   :  { %s293_s12 = smov [#allocation7]   ;;  %s217_s16 = scalar_lea.hbm %s384_s2, 128 }
  0x24   :  { %s55_s13 = sshll.u32 %s293_s12, 4  ;;  %p218_p2 = scmp.ne.s32.totalorder %s384_s2, %s217_s16  ;;  %s56_s13 = int_to_ptr.vmem [resolvable:$true] %s55_s13 }
  0x25   :  { %p221_p3 = scmp.lt.u32.totalorder %s217_s16, %s384_s2 }
  0x27   :  { %p223_p4 = pnand %p221_p3, %p218_p2 }
  0x29   :  { %226 = shalt.err (!%p223_p4)
}
  0x2a   :  { %s227_s22 = scalar_lea.vmem %s56_s13, 128  ;;  %p232_p6 = scmp.lt.s32.totalorder %s56_s13, %s56_s13 }
  0x2b   :  { %p228_p5 = scmp.ne.s32.totalorder %s56_s13, %s227_s22  ;;  %p233_p7 = scmp.lt.s32.totalorder %s227_s22, %s227_s22 }
  0x2d   :  { %p234_p8 = por %p233_p7, %p232_p6 }
  0x2f   :  { %p235_p9 = pnand %p234_p8, %p228_p5 }
  0x31   :  { %238 = shalt.err (!%p235_p9)
}
  0x32   :  { %58 = dma.hbm_to_vmem [thread:$0]  %s384_s2, 128, %s56_s13, [#allocation6]  }
  0x33   :  { %283 = dma.done.wait [#allocation3], 128  }
  0x34   :  { %284 = vsyncadd [#allocation3], 4294967168 }
  0x35   :  { %285 = dma.done.wait [#allocation6], 256  }
  0x36   :  { %286 = vsyncadd [#allocation6], 4294967040  ;;  %s294_s23 = smov [#allocation9]   ;;  %v90_v0 = vld [vmem:[#allocation2] sm:$0xff]  ;;  %v91_v1 = vld [vmem:[#allocation5] sm:$0xff] }
  0x37   :  { %s144_s24 = sshll.u32 %s294_s23, 4  ;;  %v92_v2 = vld [vmem:[#allocation7] sm:$0xff]  ;;  %s145_s24 = int_to_ptr.vmem [resolvable:$true] %s144_s24 }
  0x38   :  { %v93_v3 = vmul.f32 %v92_v2, %v90_v0  ;;  %v94_v4 = vmul.f32 %v92_v2, %v91_v1  ;;  %127 = vst [vmem:[#allocation9] sm:$0xff] %v92_v2  ;;  %s239_s25 = scalar_lea.vmem %s145_s24, 128  ;;  %p244_p11 = scmp.lt.s32.totalorder %s145_s24, %s145_s24 }
  0x39   :  { %p240_p10 = scmp.ne.s32.totalorder %s145_s24, %s239_s25  ;;  %p245_p12 = scmp.lt.s32.totalorder %s239_s25, %s239_s25 }
  0x3a   :  { %vm95_vm0 = vcmp.eq.f32.partialorder %v94_v4, -1.0  ;;  %v100_v5 = vsub.f32 %v93_v3, %v94_v4 }
  0x3b   :  { %p246_p13 = por %p245_p12, %p244_p11 }
  0x3d   :  { %p247_p0 = pnand %p246_p13, %p240_p10 }
  0x3f   :  { %250 = shalt.err (!%p247_p0)
}
  0x40   :  { %s251_s27 = scalar_lea.hbm %s386_s4, 128 }
  0x41   :  { %p252_p1 = scmp.ne.s32.totalorder %s386_s4, %s251_s27  ;;  %p255_p2 = scmp.lt.u32.totalorder %s251_s27, %s386_s4 }
  0x43   :  { %p257_p3 = pnand %p255_p2, %p252_p1 }
  0x45   :  { %260 = shalt.err (!%p257_p3)
}
  0x46   :  { %147 = dma.vmem_to_hbm [thread:$0]  %s145_s24, 128, %s386_s4, [#allocation10]   ;;  %v101_v6 = vsel %vm95_vm0, 0.0, %v100_v5 }
  0x47   :  { %v102_v7 = vand.u32 2147483647, %v101_v6  ;;  %s295_s8 = smov [#allocation8]  }
  0x48   :  { %s134_s9 = sshll.u32 %s295_s8, 4  ;;  %s135_s9 = int_to_ptr.vmem [resolvable:$true] %s134_s9 }
  0x49   :  { %v104_v8 = vmul.f32 0.5, %v102_v7  ;;  %v164_v16 = vadd.f32 7.917595, %v102_v7  ;;  %vm103_vm2 = vcmp.lt.f32.partialorder %v102_v7, 10.0  ;;  %s261_s4 = scalar_lea.vmem %s135_s9, 128  ;;  %p266_p5 = scmp.lt.s32.totalorder %s135_s9, %s135_s9 }
  0x4a   :  { %p262_p4 = scmp.ne.s32.totalorder %s135_s9, %s261_s4  ;;  %p267_p6 = scmp.lt.s32.totalorder %s261_s4, %s261_s4 }
  0x4b   :  { %v105_v9 = vadd.f32 1.0, %v104_v8  ;;  %v108_v10 = vmul.f32 -0.5, %v104_v8  ;;  %v111_v12 = vand.u32 2147483647, %v104_v8 }
  0x4c   :  { %p268_p7 = por %p267_p6, %p266_p5 }
  0x4d   :  { %171 = vlog2.f32 %v105_v9  ;;  %v109_v11 = vadd.f32 1.0, %v108_v10  ;;  %vm112_vm1 = vcmp.lt.f32.partialorder %v111_v12, 0.0004427343 }
  0x4e   :  { %p269_p8 = pnand %p268_p7, %p262_p4 }
  0x4f   :  { %v110_v13 = vmul.f32 %v109_v11, %v104_v8 }
  0x57   :  { %v172_v14 = vpop.eup %171 }
  0x58   :  { %v107_v15 = vmul.f32 0.6931472, %v172_v14 }
  0x5a   :  { %v113_v17 = vsel %vm112_vm1, %v110_v13, %v107_v15 }
  0x5b   :  { %v114_v18 = vmul.f32 10.0, %v113_v17 }
  0x5d   :  { %v116_v19 = vsel %vm103_vm2, %v114_v18, %v164_v16 }
  0x5e   :  { %123 = vst [vmem:[#allocation8] sm:$0xff] %v116_v19 }
  0x5f   :  { %272 = shalt.err (!%p269_p8)
}
  0x60   :  { %s273_s11 = scalar_lea.hbm %s385_s3, 128 }
  0x61   :  { %p274_p9 = scmp.ne.s32.totalorder %s385_s3, %s273_s11  ;;  %p277_p10 = scmp.lt.u32.totalorder %s273_s11, %s385_s3 }
  0x63   :  { %p279_p11 = pnand %p277_p10, %p274_p9 }
  0x65   :  { %282 = shalt.err (!%p279_p11)
}
  0x66   :  { %137 = dma.vmem_to_hbm [thread:$0]  %s135_s9, 128, %s385_s3, [#allocation4]  }
  0x67   :  { %287 = dma.done.wait [#allocation4], 128  }
  0x68   :  { %288 = vsyncadd [#allocation4], 4294967168 }
  0x69   :  { %289 = dma.done.wait [#allocation10], 128  }
  0x6a   :  { %290 = vsyncadd [#allocation10], 4294967168 }
  0x6b   :  { %154 = vsyncpa [#allocation3], 1 }
  0x6c   :  { %155 = vsyncpa [#allocation6], 1 }
  0x6d   :  { %156 = vsyncpa [#allocation4], 1 }
  0x6e   :  { %157 = vsyncpa [#allocation10], 1 }

</bundles_post_ra>
